<compile_context>
chip_gen: v6e
topology: v6e:2x2x1
jax: 0.10.0
libtpu: 0.0.40
codegen_flags: <defaults>
</compile_context>

<pallas_src>
import functools

import jax
import jax.numpy as jnp
from jax.experimental import pallas as pl
from jax.experimental.pallas import tpu as pltpu


def _encoder_kernel(x_ref,
                    w1_ref, b1_ref,   # fc1:  D_in -> H
                    w3_ref, b3_ref,   # fc3:  H    -> 2L
                    wo_ref, bo_ref,   # [linear_means | linear_log_var]: 2L -> 2L
                    o_ref):
    x = x_ref[...]

    # fc1 + LeakyReLU(0.2)   (MXU matmul, f32 accumulation; elementwise in f32)
    h = jnp.dot(x, w1_ref[...], preferred_element_type=jnp.float32) + b1_ref[...]
    h = jnp.where(h >= 0, h, 0.2 * h)

    # fc3 + LeakyReLU(0.2)
    h = jnp.dot(h.astype(w3_ref.dtype), w3_ref[...],
                preferred_element_type=jnp.float32) + b3_ref[...]
    h = jnp.where(h >= 0, h, 0.2 * h)

    # Fused heads: one lane-dense matmul producing [means | log_vars].
    out = jnp.dot(h.astype(wo_ref.dtype), wo_ref[...],
                  preferred_element_type=jnp.float32) + bo_ref[...]
    o_ref[...] = out.astype(o_ref.dtype)


@functools.partial(jax.jit, static_argnames=("block_b", "compute_dtype"))
def encoder_forward(x, c, params, *, block_b=128, compute_dtype=jnp.float32):
    """x: (B, feat) f32, c: (B, latent) f32 or None. Returns (means, log_vars)."""
    if c is not None:
        x = jnp.concatenate([x, c], axis=-1)
    B, D_in = x.shape

    # Cast matmul operands to compute dtype (bf16 recommended for large shapes);
    # biases stay f32 (added after f32 accumulation).
    w1 = params["w1"].astype(compute_dtype)                                  # (D_in, H)
    w3 = params["w3"].astype(compute_dtype)                                  # (H, 2L)
    wo = jnp.concatenate([params["wm"], params["wv"]], axis=1).astype(compute_dtype)  # (2L, 2L)
    b1 = params["b1"].astype(jnp.float32)
    b3 = params["b3"].astype(jnp.float32)
    bo = jnp.concatenate([params["bm"], params["bv"]], axis=1).astype(jnp.float32)

    H = w1.shape[1]
    two_l = wo.shape[1]
    latent = two_l // 2

    # Batch tiling: MXU-friendly tiles, sublane-aligned, pad remainder rows.
    block_b = max(8, min(block_b, B))
    block_b = -(-block_b // 8) * 8                 # round up to multiple of 8
    b_pad = -(-B // block_b) * block_b             # pl.cdiv-style padding
    if b_pad != B:
        x = jnp.pad(x, ((0, b_pad - B), (0, 0)))
    x = x.astype(compute_dtype)
    grid = (b_pad // block_b,)

    # VMEM budget: resident weights (single-buffered) + double-buffered x/out
    # tiles + intermediates.  Clamp so it is valid on v5e/v6e/v7x alike.
    itemsize = jnp.dtype(compute_dtype).itemsize
    weight_bytes = ((w1.size + w3.size + wo.size) * itemsize
                    + (b1.size + b3.size + bo.size) * 4)
    act_bytes = 2 * block_b * (D_in * itemsize + two_l * 4)
    scratch_bytes = block_b * (H + two_l) * 4
    vmem_limit = int(min(max(2 * (weight_bytes + act_bytes + scratch_bytes),
                             32 * 1024 * 1024),
                         56 * 1024 * 1024))

    flops = 2 * b_pad * (D_in * H + H * two_l + two_l * two_l)
    bytes_accessed = b_pad * D_in * itemsize + weight_bytes + b_pad * two_l * 4
    cost = pl.CostEstimate(flops=flops, transcendentals=0,
                           bytes_accessed=bytes_accessed)

    # Untiled, VMEM-resident (single-buffered) weights/biases.
    vmem_full = pl.BlockSpec(memory_space=pltpu.MemorySpace.VMEM)

    out = pl.pallas_call(
        _encoder_kernel,
        out_shape=jax.ShapeDtypeStruct((b_pad, two_l), jnp.float32),
        grid=grid,
        in_specs=[
            pl.BlockSpec((block_b, D_in), lambda i: (i, 0)),  # x tile (pipelined)
            vmem_full, vmem_full,                             # w1, b1
            vmem_full, vmem_full,                             # w3, b3
            vmem_full, vmem_full,                             # wo, bo
        ],
        out_specs=pl.BlockSpec((block_b, two_l), lambda i: (i, 0)),
        compiler_params=pltpu.CompilerParams(
            dimension_semantics=("parallel",),
            vmem_limit_bytes=vmem_limit),
        cost_estimate=cost,
    )(x, w1, b1, w3, b3, wo, bo)

    out = out[:B]
    return out[:, :latent], out[:, latent:]


def init_params(key, in_dim, hidden, latent):
    """weights_init: Linear W ~ N(0, 0.02), b = 0.
    Weights stored transposed as (in_features, out_features)."""
    ks = jax.random.split(key, 4)
    std = 0.02
    return {
        "w1": std * jax.random.normal(ks[0], (in_dim, hidden), jnp.float32),
        "b1": jnp.zeros((1, hidden), jnp.float32),
        "w3": std * jax.random.normal(ks[1], (hidden, 2 * latent), jnp.float32),
        "b3": jnp.zeros((1, 2 * latent), jnp.float32),
        "wm": std * jax.random.normal(ks[2], (2 * latent, latent), jnp.float32),
        "bm": jnp.zeros((1, latent), jnp.float32),
        "wv": std * jax.random.normal(ks[3], (2 * latent, latent), jnp.float32),
        "bv": jnp.zeros((1, latent), jnp.float32),
    }


def _reference(x, c, p):
    xc = jnp.concatenate([x, c], axis=-1) if c is not None else x
    lrelu = lambda v: jnp.where(v >= 0, v, 0.2 * v)
    h = lrelu(xc @ p["w1"] + p["b1"])
    h = lrelu(h @ p["w3"] + p["b3"])
    return h @ p["wm"] + p["bm"], h @ p["wv"] + p["bv"]


if __name__ == "__main__":
    key = jax.random.PRNGKey(0)
    k_x, k_c, k_p = jax.random.split(key, 3)

    # opt.encoder_layer_sizes = [20, 32], opt.latent_size = 16
    #   -> fc1: (20+16)->32, fc3: 32->32, heads: 32->16 each.
    batch, feat, latent, hidden = 8, 20, 16, 32
    x = jax.random.normal(k_x, (batch, feat), jnp.float32)
    c = jax.random.normal(k_c, (batch, latent), jnp.float32)
    params = init_params(k_p, feat + latent, hidden, latent)

    # f32 path — exact check against the pure-JAX reference.
    means, log_vars = encoder_forward(x, c, params, block_b=128,
                                      compute_dtype=jnp.float32)
    jax.block_until_ready((means, log_vars))

    ref_m, ref_v = _reference(x, c, params)
    assert means.shape == (batch, latent) and log_vars.shape == (batch, latent)
    assert jnp.allclose(means, ref_m, atol=1e-5, rtol=1e-5), "means mismatch (f32)"
    assert jnp.allclose(log_vars, ref_v, atol=1e-5, rtol=1e-5), "log_vars mismatch (f32)"

    # bf16 fast path (f32 MXU accumulation) — looser tolerance.
    means_bf, logv_bf = encoder_forward(x, c, params, block_b=128,
                                        compute_dtype=jnp.bfloat16)
    jax.block_until_ready((means_bf, logv_bf))
    assert jnp.allclose(means_bf, ref_m, atol=5e-3, rtol=5e-2), "means mismatch (bf16)"
    assert jnp.allclose(logv_bf, ref_v, atol=5e-3, rtol=5e-2), "log_vars mismatch (bf16)"

    print("KERNEL_OK")
</pallas_src>

<mosaic_0001>
module attributes {stable_mosaic.version = 11 : i64} {
  func.func @_encoder_kernel(%arg0: i32, %arg1: memref<8x36xf32, #tpu.memory_space<vmem>>, %arg2: memref<36x32xf32, #tpu.memory_space<vmem>>, %arg3: memref<1x32xf32, #tpu.memory_space<vmem>>, %arg4: memref<32x32xf32, #tpu.memory_space<vmem>>, %arg5: memref<1x32xf32, #tpu.memory_space<vmem>>, %arg6: memref<32x32xf32, #tpu.memory_space<vmem>>, %arg7: memref<1x32xf32, #tpu.memory_space<vmem>>, %arg8: memref<8x32xf32, #tpu.memory_space<vmem>>) attributes {dimension_semantics = [#tpu.dimension_semantics<parallel>], iteration_bounds = array<i64: 1>, scalar_prefetch = 0 : i64, scratch_operands = 0 : i64, tpu.core_type = #tpu.core_type<tc>, window_params = [{transform_indices = @transform_0, window_bounds = array<i64: 8, 36>}, {pipeline_mode = #tpu.pipeline_mode<synchronous>, transform_indices = @transform_1, window_bounds = array<i64: 36, 32>}, {pipeline_mode = #tpu.pipeline_mode<synchronous>, transform_indices = @transform_2, window_bounds = array<i64: 1, 32>}, {pipeline_mode = #tpu.pipeline_mode<synchronous>, transform_indices = @transform_3, window_bounds = array<i64: 32, 32>}, {pipeline_mode = #tpu.pipeline_mode<synchronous>, transform_indices = @transform_4, window_bounds = array<i64: 1, 32>}, {pipeline_mode = #tpu.pipeline_mode<synchronous>, transform_indices = @transform_5, window_bounds = array<i64: 32, 32>}, {pipeline_mode = #tpu.pipeline_mode<synchronous>, transform_indices = @transform_6, window_bounds = array<i64: 1, 32>}, {transform_indices = @transform_7, window_bounds = array<i64: 8, 32>}]} {
    %c0 = arith.constant 0 : index
    %c0_0 = arith.constant 0 : index
    %0 = vector.load %arg1[%c0, %c0_0] : memref<8x36xf32, #tpu.memory_space<vmem>>, vector<8x36xf32>
    %c0_1 = arith.constant 0 : index
    %c0_2 = arith.constant 0 : index
    %1 = vector.load %arg2[%c0_1, %c0_2] : memref<36x32xf32, #tpu.memory_space<vmem>>, vector<36x32xf32>
    %cst = arith.constant dense<0.000000e+00> : vector<8x32xf32>
    %2 = tpu.matmul %0, %1, %cst {dimension_numbers = #tpu.dot_dimension_numbers<[1], [0], [0], [1], [0, 0, 1, 1], [], []>} : vector<8x36xf32>, vector<36x32xf32>, vector<8x32xf32> -> vector<8x32xf32>
    %c0_3 = arith.constant 0 : index
    %c0_4 = arith.constant 0 : index
    %3 = vector.load %arg3[%c0_3, %c0_4] : memref<1x32xf32, #tpu.memory_space<vmem>>, vector<1x32xf32>
    %4 = vector.broadcast %3 : vector<1x32xf32> to vector<8x32xf32>
    %5 = arith.addf %2, %4 : vector<8x32xf32>
    %cst_5 = arith.constant 0.000000e+00 : f32
    %6 = vector.broadcast %cst_5 : f32 to vector<8x32xf32>
    %7 = arith.cmpf oge, %5, %6 : vector<8x32xf32>
    %cst_6 = arith.constant 2.000000e-01 : f32
    %8 = vector.broadcast %cst_6 : f32 to vector<8x32xf32>
    %9 = arith.mulf %8, %5 : vector<8x32xf32>
    %10 = arith.select %7, %5, %9 : vector<8x32xi1>, vector<8x32xf32>
    %c0_7 = arith.constant 0 : index
    %c0_8 = arith.constant 0 : index
    %11 = vector.load %arg4[%c0_7, %c0_8] : memref<32x32xf32, #tpu.memory_space<vmem>>, vector<32x32xf32>
    %cst_9 = arith.constant dense<0.000000e+00> : vector<8x32xf32>
    %12 = tpu.matmul %10, %11, %cst_9 {dimension_numbers = #tpu.dot_dimension_numbers<[1], [0], [0], [1], [0, 0, 1, 1], [], []>} : vector<8x32xf32>, vector<32x32xf32>, vector<8x32xf32> -> vector<8x32xf32>
    %c0_10 = arith.constant 0 : index
    %c0_11 = arith.constant 0 : index
    %13 = vector.load %arg5[%c0_10, %c0_11] : memref<1x32xf32, #tpu.memory_space<vmem>>, vector<1x32xf32>
    %14 = vector.broadcast %13 : vector<1x32xf32> to vector<8x32xf32>
    %15 = arith.addf %12, %14 : vector<8x32xf32>
    %cst_12 = arith.constant 0.000000e+00 : f32
    %16 = vector.broadcast %cst_12 : f32 to vector<8x32xf32>
    %17 = arith.cmpf oge, %15, %16 : vector<8x32xf32>
    %cst_13 = arith.constant 2.000000e-01 : f32
    %18 = vector.broadcast %cst_13 : f32 to vector<8x32xf32>
    %19 = arith.mulf %18, %15 : vector<8x32xf32>
    %20 = arith.select %17, %15, %19 : vector<8x32xi1>, vector<8x32xf32>
    %c0_14 = arith.constant 0 : index
    %c0_15 = arith.constant 0 : index
    %21 = vector.load %arg6[%c0_14, %c0_15] : memref<32x32xf32, #tpu.memory_space<vmem>>, vector<32x32xf32>
    %cst_16 = arith.constant dense<0.000000e+00> : vector<8x32xf32>
    %22 = tpu.matmul %20, %21, %cst_16 {dimension_numbers = #tpu.dot_dimension_numbers<[1], [0], [0], [1], [0, 0, 1, 1], [], []>} : vector<8x32xf32>, vector<32x32xf32>, vector<8x32xf32> -> vector<8x32xf32>
    %c0_17 = arith.constant 0 : index
    %c0_18 = arith.constant 0 : index
    %23 = vector.load %arg7[%c0_17, %c0_18] : memref<1x32xf32, #tpu.memory_space<vmem>>, vector<1x32xf32>
    %24 = vector.broadcast %23 : vector<1x32xf32> to vector<8x32xf32>
    %25 = arith.addf %22, %24 : vector<8x32xf32>
    %c0_19 = arith.constant 0 : index
    %c0_20 = arith.constant 0 : index
    %26 = vector.load %arg8[%c0_19, %c0_20] : memref<8x32xf32, #tpu.memory_space<vmem>>, vector<8x32xf32>
    tpu.vector_store %arg8[%c0_19, %c0_20], %25 {strides = array<i32>} : memref<8x32xf32, #tpu.memory_space<vmem>>, vector<8x32xf32>,
    return
  }
  func.func @transform_0(%arg0: i32) -> (i32, i32) {
    %c0_i32 = arith.constant 0 : i32
    %c0_i32_0 = arith.constant 0 : i32
    return %arg0, %c0_i32 : i32, i32
  }
  func.func @transform_1(%arg0: i32) -> (i32, i32) {
    %c0_i32 = arith.constant 0 : i32
    %c0_i32_0 = arith.constant 0 : i32
    %c0_i32_1 = arith.constant 0 : i32
    return %c0_i32, %c0_i32_0 : i32, i32
  }
  func.func @transform_2(%arg0: i32) -> (i32, i32) {
    %c0_i32 = arith.constant 0 : i32
    %c0_i32_0 = arith.constant 0 : i32
    %c0_i32_1 = arith.constant 0 : i32
    return %c0_i32, %c0_i32_0 : i32, i32
  }
  func.func @transform_3(%arg0: i32) -> (i32, i32) {
    %c0_i32 = arith.constant 0 : i32
    %c0_i32_0 = arith.constant 0 : i32
    %c0_i32_1 = arith.constant 0 : i32
    return %c0_i32, %c0_i32_0 : i32, i32
  }
  func.func @transform_4(%arg0: i32) -> (i32, i32) {
    %c0_i32 = arith.constant 0 : i32
    %c0_i32_0 = arith.constant 0 : i32
    %c0_i32_1 = arith.constant 0 : i32
    return %c0_i32, %c0_i32_0 : i32, i32
  }
  func.func @transform_5(%arg0: i32) -> (i32, i32) {
    %c0_i32 = arith.constant 0 : i32
    %c0_i32_0 = arith.constant 0 : i32
    %c0_i32_1 = arith.constant 0 : i32
    return %c0_i32, %c0_i32_0 : i32, i32
  }
  func.func @transform_6(%arg0: i32) -> (i32, i32) {
    %c0_i32 = arith.constant 0 : i32
    %c0_i32_0 = arith.constant 0 : i32
    %c0_i32_1 = arith.constant 0 : i32
    return %c0_i32, %c0_i32_0 : i32, i32
  }
  func.func @transform_7(%arg0: i32) -> (i32, i32) {
    %c0_i32 = arith.constant 0 : i32
    %c0_i32_0 = arith.constant 0 : i32
    return %arg0, %c0_i32 : i32, i32
  }
}

</mosaic_0001>

<bundles_post_ra>
// kernel: encoder_forward.1
= control target key start
LH: loop header
LB: loop body
LE: loop exit
PB: predicated region body
PF: predicated region fallthrough
CT: control target
= control target key end

     0   :  { %vm43_vm0 = vcmask 1043456   ;;  %v357_v0 = vmov 0.0   ;;  %vm358_vm1 = vmmov 0   ;;  %vm39_vm2 = vcmask 293888   ;;  %s459_s1 = inlined_call_operand.vmem [shape: f32[36,32], index: 1, kind: input, shape index: {}]   ;;  %s460_s3 = inlined_call_operand.vmem [shape: f32[32,32], index: 3, kind: input, shape index: {}]   ;;  %s461_s0 = inlined_call_operand.vmem [shape: f32[8,36], index: 0, kind: input, shape index: {}]   ;;  %s462_s2 = inlined_call_operand.vmem [shape: f32[1,32], index: 2, kind: input, shape index: {}]   ;;  %s463_s5 = inlined_call_operand.vmem [shape: f32[32,32], index: 5, kind: input, shape index: {}]   ;;  %s464_s4 = inlined_call_operand.vmem [shape: f32[1,32], index: 4, kind: input, shape index: {}]   ;;  %s465_s6 = inlined_call_operand.vmem [shape: f32[1,32], index: 6, kind: input, shape index: {}]   ;;  %s466_s7 = inlined_call_operand.vmem [shape: f32[8,32], index: 7, kind: output, shape index: {}]  }
   0x1   :  { %320 = vmatprep.subr.mxu0 %v357_v0  ;;  %v31_v1 = vld [vmem:[%s459_s1 + $0x20] sm:$0xf]  ;;  %v30_v2 = vld [vmem:[%s459_s1 + $0x18] sm:$0xff]  ;;  %330 = vmatprep.mubr.msk.f32.mxu0 %vm358_vm1, %v357_v0  ;;  %v29_v3 = vld [vmem:[%s459_s1 + $0x10] sm:$0xff]  ;;  %vm131_vm4 = vcmask 261120  }
   0x2   :  { %321 = vmatpush3.msk.msra.mxu0 %vm43_vm0, %v31_v1  ;;  %333 = vmatprep.subr.mxu1 %v357_v0  ;;  %v123_v4 = vld [vmem:[%s460_s3 + $0x18] sm:$0xff]  ;;  %v28_v5 = vld [vmem:[%s459_s1 + $0x8] sm:$0xff]  ;;  %v27_v6 = vld [vmem:[%s459_s1] sm:$0xff] }
   0x3   :  { %322 = vmatprep.subr.mxu0 %v357_v0  ;;  %341 = vmatprep.mubr.msk.f32.mxu1 %vm358_vm1, %v357_v0  ;;  %v26_v7 = vld [vmem:[%s461_s0] sm:$0xff]  ;;  %v122_v8 = vld [vmem:[%s460_s3 + $0x10] sm:$0xff]  ;;  %v121_v9 = vld [vmem:[%s460_s3 + $0x8] sm:$0xff] }
   0x4   :  { %323 = vmatpush3.msra.mxu0 %v30_v2  ;;  %334 = vmatpush3.msra.mxu1 %v123_v4  ;;  %v120_v10 = vld [vmem:[%s460_s3] sm:$0xff]  ;;  %v211_v16 = vld [vmem:[%s463_s5 + $0x18] sm:$0xff]  ;;  %v210_v18 = vld [vmem:[%s463_s5 + $0x10] sm:$0xff] }
   0x5   :  { %324 = vmatprep.subr.mxu0 %v357_v0  ;;  %335 = vmatprep.subr.mxu1 %v357_v0  ;;  %v297_v11 = vld [vmem:[%s462_s2] ss:$0 sm:$0xff]  ;;  %v209_v19 = vld [vmem:[%s463_s5 + $0x8] sm:$0xff] }
   0x6   :  { %325 = vmatpush3.msra.mxu0 %v29_v3  ;;  %336 = vmatpush3.msra.mxu1 %v122_v8  ;;  %v208_v20 = vld [vmem:[%s463_s5] sm:$0xff] }
   0x7   :  { %326 = vmatprep.subr.mxu0 %v357_v0  ;;  %337 = vmatprep.subr.mxu1 %v357_v0  ;;  %v300_v21 = vld [vmem:[%s464_s4] ss:$0 sm:$0xff] }
   0x8   :  { %327 = vmatpush3.msra.mxu0 %v28_v5  ;;  %338 = vmatpush3.msra.mxu1 %v121_v9  ;;  %v302_v27 = vld [vmem:[%s465_s6] ss:$0 sm:$0xff] }
   0x9   :  { %328 = vmatprep.subr.mxu0 %v357_v0  ;;  %339 = vmatprep.subr.mxu1 %v357_v0 }
   0xa   :  { %329 = vmatpush3.msra.mxu0 %v27_v6  ;;  %340 = vmatpush3.msra.mxu1 %v120_v10 }
   0xb   :  { %331 = vmatmul.mubr.msk.f32.vlgmr.msra.gmra.mxu0 %vm39_vm2, %v26_v7  ;;  %344 = vmatprep.subr.mxu1 %v357_v0 }
  0xcb   :  { %v113_v12 = vpop.f32.mrf.mxu0 }
  0xcc   :  { %v114_v13 = vadd.f32 %v297_v11, %v113_v12 }
  0xcd   :  { %v332_v14 = vpop.f32.mrf.mxu0 }
  0xce   :  { %vm117_vm3 = vcmp.ge.f32.partialorder %v114_v13, 0.0  ;;  %v118_v15 = vmul.f32 0.2, %v114_v13 }
  0xd0   :  { %v119_v17 = vsel %vm117_vm3, %v114_v13, %v118_v15 }
  0xd1   :  { %342 = vmatmul.mubr.msk.f32.vlgmr.msra.gmra.mxu1 %vm131_vm4, %v119_v17 }
  0xd2   :  { %345 = vmatpush3.msra.mxu1 %v211_v16  ;;  %352 = vmatprep.mubr.msk.f32.mxu1 %vm358_vm1, %v357_v0 }
  0xd3   :  { %346 = vmatprep.subr.mxu1 %v357_v0 }
  0xd4   :  { %347 = vmatpush3.msra.mxu1 %v210_v18 }
  0xd5   :  { %348 = vmatprep.subr.mxu1 %v357_v0 }
  0xd6   :  { %349 = vmatpush3.msra.mxu1 %v209_v19 }
  0xd7   :  { %350 = vmatprep.subr.mxu1 %v357_v0 }
  0xd8   :  { %351 = vmatpush3.msra.mxu1 %v208_v20 }
 0x191   :  { %v201_v22 = vpop.f32.mrf.mxu1 }
 0x192   :  { %v202_v23 = vadd.f32 %v300_v21, %v201_v22 }
 0x193   :  { %v343_v24 = vpop.f32.mrf.mxu1 }
 0x194   :  { %vm205_vm5 = vcmp.ge.f32.partialorder %v202_v23, 0.0  ;;  %v206_v25 = vmul.f32 0.2, %v202_v23 }
 0x196   :  { %v207_v26 = vsel %vm205_vm5, %v202_v23, %v206_v25 }
 0x197   :  { %353 = vmatmul.mubr.msk.f32.vlgmr.msra.gmra.mxu1 %vm131_vm4, %v207_v26 }
 0x257   :  { %v288_v28 = vpop.f32.mrf.mxu1 }
 0x258   :  { %v289_v29 = vadd.f32 %v302_v27, %v288_v28 }
 0x259   :  { %v354_v30 = vpop.f32.mrf.mxu1 }
 0x25a   :  { %292 = vst.msk [vmem:[%s466_s7] sm:$0xff] %vm131_vm4, %v289_v29 }

</bundles_post_ra>
